<compile_context>
chip_gen: v5e
topology: v5e:2x2
jax: 0.10.0
libtpu: 0.0.40
codegen_flags: <defaults>
</compile_context>

<pallas_src>
import jax
import jax.numpy as jnp
from jax.experimental import pallas as pl
from jax.experimental.pallas import tpu as pltpu

_LANE = 128
_SUBLANE = 8


def _round_up(x: int, m: int) -> int:
    return ((x + m - 1) // m) * m


# ----------------------------- kernel -------------------------------------- #

def _broadcast_kernel(factors_ref, out_ref):
    # factors_ref: (1, Npad) VMEM tile, resident across the grid (constant index_map).
    # out_ref:     (TB, Npad) VMEM tile.  Store-only kernel: the broadcast of one
    # sublane row is replicated reads; the HBM writeback DMA is the only real cost.
    # (If a bundle dump ever shows a materialized intermediate, replace with
    #  out_ref[...] = factors_ref[pl.ds(0, out_ref.shape[0], stride=0), :].)
    out_ref[...] = jnp.broadcast_to(factors_ref[...], out_ref.shape)


# --------------------------- tiling helpers -------------------------------- #

def _choose_tile_rows(batch: int, row_bytes: int,
                      target_bytes: int = 8 * 1024 * 1024) -> int:
    """Pick a batch tile so each output block is ~target_bytes.

    * multiple of 8 rows (sublane-aligned partial blocks)
    * at least 2 grid blocks whenever the full output exceeds ~2 MiB, so the
      "parallel" batch axis shards across both TensorCores on v7x.
    """
    total_bytes = batch * row_bytes
    rows = max(1, target_bytes // max(row_bytes, 1))
    rows = max(_SUBLANE, (rows // _SUBLANE) * _SUBLANE)
    if total_bytes > 2 * 1024 * 1024:
        half = _round_up(pl.cdiv(batch, 2), _SUBLANE)
        rows = min(rows, half)
    return max(1, min(rows, batch))


def _broadcast_rows(factors_row: jax.Array, batch: int, tile_rows=None) -> jax.Array:
    """Broadcast a (1, Npad) row to (batch, Npad) with a batch-tiled Pallas kernel."""
    n = factors_row.shape[-1]
    itemsize = factors_row.dtype.itemsize
    if tile_rows is None:
        tile_rows = _choose_tile_rows(batch, n * itemsize)
    tile_rows = max(1, min(tile_rows, batch))
    grid = (pl.cdiv(batch, tile_rows),)

    tile_bytes = tile_rows * n * itemsize
    # Double-buffered output + (conservatively double-buffered) factors row + slack.
    # Never set below the smallest default scoped budget (16 MiB on v5e).
    vmem_limit = max(2 * tile_bytes + 2 * n * itemsize + (1 << 20), 16 << 20)

    return pl.pallas_call(
        _broadcast_kernel,
        out_shape=jax.ShapeDtypeStruct((batch, n), factors_row.dtype),
        grid=grid,
        in_specs=[pl.BlockSpec((1, n), lambda i: (0, 0))],          # resident factors
        out_specs=pl.BlockSpec((tile_rows, n), lambda i: (i, 0)),   # batch-tiled output
        compiler_params=pltpu.CompilerParams(
            dimension_semantics=("parallel",),
            vmem_limit_bytes=int(vmem_limit)),
        cost_estimate=pl.CostEstimate(
            flops=0, transcendentals=0,
            bytes_accessed=batch * n * itemsize + n * itemsize),
    )(factors_row)


# ----------------------------- wrapper ------------------------------------- #

class ParentIndependentBinarySelectionModelPallas:
    """JAX/Pallas analog of the PyTorch module.

    Parameters are created deterministically in-script (no checkpoint load).
    Set zero_init=True for strict parity with the PyTorch zeros initialization.
    """

    def __init__(self, max_seq_len: int = 512, output_dim: int = 1, key=None,
                 zero_init: bool = False):
        self.max_seq_len = max_seq_len
        self.output_dim = output_dim
        shape = (max_seq_len,) if output_dim == 1 else (max_seq_len, output_dim)
        if zero_init:
            self.log_selection_factors = jnp.zeros(shape, dtype=jnp.float32)
        else:
            if key is None:
                key = jax.random.PRNGKey(0)
            # Non-trivial init so the broadcast is actually exercised/verifiable.
            self.log_selection_factors = jax.random.normal(key, shape, jnp.float32)

    def forward(self, amino_acid_indices, mask, tile_rows=None,
                min_pallas_bytes: int = 1 << 20, force_pallas: bool = False):
        # mask is intentionally unused (matches the reference forward()).
        del mask
        B, L = amino_acid_indices.shape
        D = self.output_dim
        # NOTE: slicing [:L] assumes L <= max_seq_len, exactly like the reference.
        if D == 1:
            factors = self.log_selection_factors[:L]                 # (L,)
            n = L
            out_shape = (B, L)
        else:
            # Lane-dense layout: flatten (L, D) -> (L*D,) so the output last dim is
            # wide; reshape back in the wrapper (consistent row-major).
            factors = self.log_selection_factors[:L, :].reshape(L * D)
            n = L * D
            out_shape = (B, L, D)

        itemsize = factors.dtype.itemsize
        if (not force_pallas) and (B * n * itemsize < min_pallas_bytes):
            # Tiny outputs: a lazy XLA broadcast fuses into consumers and avoids
            # materializing HBM writes at all -- cheaper than any kernel launch.
            return jnp.broadcast_to(factors[None, :], (B, n)).reshape(out_shape)

        # Pad the lane dimension to a multiple of 128 so stores are full-width
        # unmasked vst and the writeback DMA moves contiguous >=512 B chunks.
        n_pad = _round_up(n, _LANE)
        row = factors.reshape(1, n)
        if n_pad != n:
            row = jnp.pad(row, ((0, 0), (0, n_pad - n)))
        out = _broadcast_rows(row, B, tile_rows)                     # (B, n_pad)
        if n_pad != n:
            out = out[:, :n]
        return out.reshape(out_shape)

    __call__ = forward


# ------------------------------- main --------------------------------------- #

if __name__ == "__main__":
    key = jax.random.PRNGKey(0)
    k_param1, k_param2, k_param3, k_idx = jax.random.split(key, 4)

    B, L = 2, 8                      # small batch / sequence length
    MAX_SEQ_LEN = 512                # matches module default
    KNOWN_TOKEN_COUNT = 21

    amino_acid_indices = jax.random.randint(
        k_idx, (B, L), 0, KNOWN_TOKEN_COUNT, dtype=jnp.int32)
    mask = jnp.ones((B, L), dtype=jnp.bool_)

    # --- case 1: output_dim == 1 -> (B, L), lane-padded 8 -> 128 ---
    model1 = ParentIndependentBinarySelectionModelPallas(
        max_seq_len=MAX_SEQ_LEN, output_dim=1, key=k_param1)
    out1 = jax.block_until_ready(model1(amino_acid_indices, mask, force_pallas=True))
    ref1 = jnp.broadcast_to(model1.log_selection_factors[:L][None, :], (B, L))
    assert out1.shape == (B, L), out1.shape
    assert jnp.allclose(out1, ref1), "output_dim=1 mismatch"

    # --- case 2: output_dim == 20 -> (B, L, 20), lane-padded 160 -> 256 ---
    D = 20
    model2 = ParentIndependentBinarySelectionModelPallas(
        max_seq_len=MAX_SEQ_LEN, output_dim=D, key=k_param2)
    out2 = jax.block_until_ready(model2(amino_acid_indices, mask, force_pallas=True))
    ref2 = jnp.broadcast_to(
        model2.log_selection_factors[:L, :][None, :, :], (B, L, D))
    assert out2.shape == (B, L, D), out2.shape
    assert jnp.allclose(out2, ref2), "output_dim>1 mismatch"

    # --- case 3: multi-block grid over the batch (forced tile_rows=8) ---
    B3, L3 = 32, 16
    idx3 = jax.random.randint(
        jax.random.PRNGKey(1), (B3, L3), 0, KNOWN_TOKEN_COUNT, dtype=jnp.int32)
    mask3 = jnp.ones((B3, L3), dtype=jnp.bool_)
    model3 = ParentIndependentBinarySelectionModelPallas(
        max_seq_len=MAX_SEQ_LEN, output_dim=D, key=k_param3)
    out3 = jax.block_until_ready(
        model3(idx3, mask3, tile_rows=8, force_pallas=True))
    ref3 = jnp.broadcast_to(
        model3.log_selection_factors[:L3, :][None, :, :], (B3, L3, D))
    assert out3.shape == (B3, L3, D), out3.shape
    assert jnp.allclose(out3, ref3), "batch-tiled path mismatch"

    # --- case 4: small-size bypass (lazy XLA broadcast) parity ---
    out4 = jax.block_until_ready(model2(amino_acid_indices, mask))  # default cutoff
    assert jnp.allclose(out4, ref2), "bypass path mismatch"

    print("KERNEL_OK")
</pallas_src>

<mosaic_0001>
module attributes {stable_mosaic.version = 11 : i64} {
  func.func @_broadcast_kernel(%arg0: i32, %arg1: memref<1x128xf32, #tpu.memory_space<vmem>>, %arg2: memref<2x128xf32, #tpu.memory_space<vmem>>) attributes {dimension_semantics = [#tpu.dimension_semantics<parallel>], iteration_bounds = array<i64: 1>, scalar_prefetch = 0 : i64, scratch_operands = 0 : i64, tpu.core_type = #tpu.core_type<tc>, window_params = [{pipeline_mode = #tpu.pipeline_mode<synchronous>, transform_indices = @transform_0, window_bounds = array<i64: 1, 128>}, {transform_indices = @transform_1, window_bounds = array<i64: 2, 128>}]} {
    %c0 = arith.constant 0 : index
    %c0_0 = arith.constant 0 : index
    %0 = vector.load %arg1[%c0, %c0_0] : memref<1x128xf32, #tpu.memory_space<vmem>>, vector<1x128xf32>
    %1 = vector.shape_cast %0 : vector<1x128xf32> to vector<1x128xf32>
    %2 = vector.broadcast %1 : vector<1x128xf32> to vector<2x128xf32>
    %c0_1 = arith.constant 0 : index
    %c0_2 = arith.constant 0 : index
    %3 = vector.load %arg2[%c0_1, %c0_2] : memref<2x128xf32, #tpu.memory_space<vmem>>, vector<2x128xf32>
    tpu.vector_store %arg2[%c0_1, %c0_2], %2 {strides = array<i32>} : memref<2x128xf32, #tpu.memory_space<vmem>>, vector<2x128xf32>,
    return
  }
  func.func @transform_0(%arg0: i32) -> (i32, i32) {
    %c0_i32 = arith.constant 0 : i32
    %c0_i32_0 = arith.constant 0 : i32
    %c0_i32_1 = arith.constant 0 : i32
    return %c0_i32, %c0_i32_0 : i32, i32
  }
  func.func @transform_1(%arg0: i32) -> (i32, i32) {
    %c0_i32 = arith.constant 0 : i32
    %c0_i32_0 = arith.constant 0 : i32
    return %arg0, %c0_i32 : i32, i32
  }
}

</mosaic_0001>

<bundles_post_ra>
// kernel: tpu_custom_call.1
= control target key start
LH: loop header
LB: loop body
LE: loop exit
PB: predicated region body
PF: predicated region fallthrough
CT: control target
= control target key end

     0   :  { %6 = vsyncpa [#allocation3], 0  ;;  %s118_s0 = inlined_call_operand.hbm [shape: f32[1,128], index: 0, kind: input, shape index: {}]   ;;  %s119_s1 = inlined_call_operand.hbm [shape: f32[2,128], index: 1, kind: output, shape index: {}]  }
   0x1   :  { %7 = vsyncpa [#allocation4], 0  ;;  %s13_s8 = sshll.u32 %s118_s0, 4  ;;  %s100_s9 = smov [#allocation2]   ;;  %s14_s8 = int_to_ptr.hbm [resolvable:$true] %s13_s8 }
   0x2   :  { %s15_s10 = sshll.u32 %s100_s9, 4  ;;  %s16_s10 = int_to_ptr.vmem [resolvable:$true] %s15_s10 }
   0x3   :  { %18 = dma.hbm_to_vmem [thread:$0]  %s14_s8, 16, %s16_s10, [#allocation3]  }
   0x4   :  { %96 = dma.done.wait [#allocation3], 16  }
   0x5   :  { %97 = vsyncadd [#allocation3], 4294967280  ;;  %s101_s11 = smov [#allocation5]   ;;  %s35_s15 = sshll.u32 %s119_s1, 4  ;;  %v47_v0 = vld [vmem:[#allocation2] ss:$0 sm:$0xff]  ;;  %s36_s15 = int_to_ptr.hbm [resolvable:$true] %s35_s15 }
   0x6   :  { %s33_s12 = sshll.u32 %s101_s11, 4  ;;  %27 = vst [vmem:[#allocation5] sm:$0x3] %v47_v0  ;;  %s34_s12 = int_to_ptr.vmem [resolvable:$true] %s33_s12 }
   0x7   :  { %38 = dma.vmem_to_hbm [thread:$0]  %s34_s12, 32, %s36_s15, [#allocation4]  }
   0x8   :  { %98 = dma.done.wait [#allocation4], 32  }
   0x9   :  { %99 = vsyncadd [#allocation4], 4294967264 }
   0xa   :  { %43 = vsyncpa [#allocation3], 1 }
   0xb   :  { %44 = vsyncpa [#allocation4], 1 }

</bundles_post_ra>
